<compile_context>
chip_gen: v6e
topology: v6e:2x2x1
jax: 0.10.0
libtpu: 0.0.40
codegen_flags: <defaults>
</compile_context>

<pallas_src>
import functools

import jax
import jax.numpy as jnp
from jax.experimental import pallas as pl
from jax.experimental.pallas import tpu as pltpu


def _round_up(x, m):
    return pl.cdiv(x, m) * m


def coder_layer_kernel(x_ref, w_ref, b_ref, o_ref, *, n_sub):
    # x_ref: (tile_m, D) activation dtype   w_ref: (3, D, D) MXU dtype
    # b_ref: (3, D) f32                      o_ref: (tile_m, D) activation dtype
    mxu_dtype = w_ref.dtype
    tm, _ = x_ref.shape
    sub = tm // n_sub

    # Hoisted per-tile loads (block-invariant inside the sub-chunk loop).
    w1 = w_ref[0]
    w2 = w_ref[1]
    w3 = w_ref[2]
    b = b_ref[...].astype(jnp.float32)                 # (3, D)
    b1 = jnp.broadcast_to(b[0:1, :], (sub, b.shape[1]))
    b2 = jnp.broadcast_to(b[1:2, :], (sub, b.shape[1]))
    b3 = jnp.broadcast_to(b[2:3, :], (sub, b.shape[1]))

    # Static (trace-time) sub-chunk loop: chunks are independent, so the LLO
    # scheduler can overlap chunk i's VPU epilogue with chunk i+1's matmuls.
    for c in range(n_sub):
        rows = pl.ds(c * sub, sub)                     # static slice -> free view
        x = x_ref[rows, :].astype(jnp.float32)         # elementwise math in f32

        # ff1 + residual + relu  (MXU-dtype operands, f32 accumulation)
        h = jnp.dot(x.astype(mxu_dtype), w1, preferred_element_type=jnp.float32)
        h = jnp.maximum(h + b1 + x, 0.0)

        # ff2 + residual + relu
        g = jnp.dot(h.astype(mxu_dtype), w2, preferred_element_type=jnp.float32)
        g = jnp.maximum(g + b2 + h, 0.0)

        # ff3 (no residual, no activation)
        y = jnp.dot(g.astype(mxu_dtype), w3, preferred_element_type=jnp.float32)
        o_ref[rows, :] = (y + b3).astype(o_ref.dtype)


def prepare_coder_params(w1, b1, w2, b2, w3, b3, *, mxu_dtype=jnp.bfloat16):
    """One-time parameter prep, hoisted out of the per-call hot path.

    Transposes the PyTorch (out, in) weights to (in, out) so the kernel computes
    x @ W, casts them to the MXU dtype (bf16 by default -> native MXU rate,
    half the weight DMA bytes), and stacks the biases into a single (3, D) f32
    array. Pass mxu_dtype=jnp.float32 for bit-faithful f32 matmuls.
    """
    w = jnp.stack([w1.T, w2.T, w3.T]).astype(mxu_dtype)      # (3, D, D)
    b = jnp.stack([b1, b2, b3]).astype(jnp.float32)          # (3, D)
    return w, b


def _choose_tile_m(m, max_tile, target_steps=8):
    """Largest 128-multiple row tile <= max_tile that still gives ~target_steps
    grid steps (>= a few steps per v7x TensorCore so the x/out DMA pipeline has
    work to hide behind), never below 128."""
    tile = min(max_tile, _round_up(m, 128))
    tile = _round_up(tile, 128)
    while tile > 128 and pl.cdiv(m, tile) < target_steps:
        tile -= 128
    return tile


def _choose_n_sub(tile):
    """Sub-chunk count for intra-tile MXU/VPU overlap (sub-chunk stays a
    multiple of 128 rows when possible, always a multiple of 8)."""
    if tile >= 1024:
        return 4
    if tile >= 256:
        return 2
    return 1


@functools.partial(jax.jit, static_argnames=("max_tile_m",))
def coder_layer(x, w_stacked, b_stacked, *, max_tile_m=2048):
    """x: (M, D) float32 or bfloat16 (bf16 halves activation HBM traffic on the
    memory-bound v5e/v6e cases). w_stacked: (3, D, D) pre-transposed (see
    prepare_coder_params). b_stacked: (3, D) float32. Output dtype == x dtype."""
    M, D = x.shape
    tm = _choose_tile_m(M, max_tile_m)
    n_sub = _choose_n_sub(tm)
    grid = (pl.cdiv(M, tm),)   # ragged last block; masked writeback discards OOB rows

    kernel = functools.partial(coder_layer_kernel, n_sub=n_sub)

    return pl.pallas_call(
        kernel,
        out_shape=jax.ShapeDtypeStruct((M, D), x.dtype),
        grid_spec=pl.GridSpec(
            grid=grid,
            in_specs=[
                pl.BlockSpec((tm, D), lambda i: (i, 0)),        # x row tile
                pl.BlockSpec((3, D, D), lambda i: (0, 0, 0)),   # weights (block-invariant)
                pl.BlockSpec((3, D), lambda i: (0, 0)),         # biases (block-invariant)
            ],
            out_specs=pl.BlockSpec((tm, D), lambda i: (i, 0)),
        ),
        compiler_params=pltpu.CompilerParams(
            # Row tiles are independent -> shard across v7x's two TensorCores.
            dimension_semantics=("parallel",),
            # ~8 MiB needed at tm=2048/D=128; raise the scoped limit so large
            # tiles also compile on v5e's 16 MiB default (stays < v7x's 64 MiB).
            vmem_limit_bytes=40 * 1024 * 1024,
        ),
    )(x, w_stacked, b_stacked)


def coder_layer_ref(x, w1, b1, w2, b2, w3, b3):
    h = jnp.maximum(x @ w1.T + b1 + x, 0.0)
    h = jnp.maximum(h @ w2.T + b2 + h, 0.0)
    return h @ w3.T + b3


if __name__ == "__main__":
    dim = 128    # feature dim (lane-aligned)
    M = 300      # rows: not a multiple of 128 -> exercises the ragged last block

    key = jax.random.PRNGKey(0)
    kx, k1, k2, k3, kb1, kb2, kb3 = jax.random.split(key, 7)

    # Deterministic init (roughly nn.Linear's uniform scale).
    bound = 1.0 / (dim ** 0.5)
    x = jax.random.normal(kx, (M, dim), dtype=jnp.float32)
    w1 = jax.random.uniform(k1, (dim, dim), jnp.float32, -bound, bound)
    w2 = jax.random.uniform(k2, (dim, dim), jnp.float32, -bound, bound)
    w3 = jax.random.uniform(k3, (dim, dim), jnp.float32, -bound, bound)
    b1 = jax.random.uniform(kb1, (dim,), jnp.float32, -bound, bound)
    b2 = jax.random.uniform(kb2, (dim,), jnp.float32, -bound, bound)
    b3 = jax.random.uniform(kb3, (dim,), jnp.float32, -bound, bound)

    ref = coder_layer_ref(x, w1, b1, w2, b2, w3, b3)

    # 1) Exact-path check (f32 MXU operands), ragged last block, tight tolerance.
    w_f32, b_f32 = prepare_coder_params(w1, b1, w2, b2, w3, b3, mxu_dtype=jnp.float32)
    out_f32 = jax.block_until_ready(coder_layer(x, w_f32, b_f32))
    assert out_f32.shape == ref.shape
    assert jnp.allclose(out_f32, ref, atol=1e-4, rtol=1e-4), "f32 path mismatch vs reference"

    # 2) Fast path: bf16 MXU weights, f32 activations/accumulation.
    w_bf16, b_bf16 = prepare_coder_params(w1, b1, w2, b2, w3, b3, mxu_dtype=jnp.bfloat16)
    out_bf16 = jax.block_until_ready(coder_layer(x, w_bf16, b_bf16))
    assert out_bf16.shape == ref.shape
    assert jnp.allclose(out_bf16, ref, atol=5e-2, rtol=5e-2), "bf16-weight path mismatch"

    # 3) Fully-reduced HBM traffic path: bf16 activations in/out as well
    #    (recommended for memory-bound v5e/v6e); looser tolerance.
    out_bf16_io = jax.block_until_ready(coder_layer(x.astype(jnp.bfloat16), w_bf16, b_bf16))
    assert out_bf16_io.dtype == jnp.bfloat16 and out_bf16_io.shape == ref.shape
    assert jnp.allclose(out_bf16_io.astype(jnp.float32), ref, atol=2e-1, rtol=2e-1), \
        "bf16-activation path mismatch"

    # 4) Larger M: exercises the multi-step grid, intra-tile sub-chunking and a
    #    partial last block together (f32 operands -> exact check).
    M2 = 2344
    x2 = jax.random.normal(jax.random.PRNGKey(1), (M2, dim), dtype=jnp.float32)
    ref2 = coder_layer_ref(x2, w1, b1, w2, b2, w3, b3)
    out2 = jax.block_until_ready(coder_layer(x2, w_f32, b_f32))
    assert out2.shape == ref2.shape
    assert jnp.allclose(out2, ref2, atol=1e-4, rtol=1e-4), "sub-chunked f32 path mismatch"

    print("KERNEL_OK")
</pallas_src>

<mosaic_0001>
module attributes {stable_mosaic.version = 11 : i64} {
  func.func @coder_layer_kernel(%arg0: i32, %arg1: memref<128x128xf32, #tpu.memory_space<vmem>>, %arg2: memref<3x128x128xf32, #tpu.memory_space<vmem>>, %arg3: memref<3x128xf32, #tpu.memory_space<vmem>>, %arg4: memref<128x128xf32, #tpu.memory_space<vmem>>) attributes {dimension_semantics = [#tpu.dimension_semantics<parallel>], iteration_bounds = array<i64: 3>, scalar_prefetch = 0 : i64, scratch_operands = 0 : i64, tpu.core_type = #tpu.core_type<tc>, window_params = [{transform_indices = @transform_0, window_bounds = array<i64: 128, 128>}, {pipeline_mode = #tpu.pipeline_mode<synchronous>, transform_indices = @transform_1, window_bounds = array<i64: 3, 128, 128>}, {pipeline_mode = #tpu.pipeline_mode<synchronous>, transform_indices = @transform_2, window_bounds = array<i64: 3, 128>}, {transform_indices = @transform_3, window_bounds = array<i64: 128, 128>}]} {
    %c0 = arith.constant 0 : index
    %c0_0 = arith.constant 0 : index
    %c0_1 = arith.constant 0 : index
    %0 = vector.load %arg2[%c0, %c0_0, %c0_1] : memref<3x128x128xf32, #tpu.memory_space<vmem>>, vector<1x128x128xf32>
    %1 = vector.shape_cast %0 : vector<1x128x128xf32> to vector<128x128xf32>
    %c1 = arith.constant 1 : index
    %c0_2 = arith.constant 0 : index
    %c0_3 = arith.constant 0 : index
    %2 = vector.load %arg2[%c1, %c0_2, %c0_3] : memref<3x128x128xf32, #tpu.memory_space<vmem>>, vector<1x128x128xf32>
    %3 = vector.shape_cast %2 : vector<1x128x128xf32> to vector<128x128xf32>
    %c2 = arith.constant 2 : index
    %c0_4 = arith.constant 0 : index
    %c0_5 = arith.constant 0 : index
    %4 = vector.load %arg2[%c2, %c0_4, %c0_5] : memref<3x128x128xf32, #tpu.memory_space<vmem>>, vector<1x128x128xf32>
    %5 = vector.shape_cast %4 : vector<1x128x128xf32> to vector<128x128xf32>
    %c0_6 = arith.constant 0 : index
    %c0_7 = arith.constant 0 : index
    %6 = vector.load %arg3[%c0_6, %c0_7] : memref<3x128xf32, #tpu.memory_space<vmem>>, vector<3x128xf32>
    %7 = vector.extract_strided_slice %6 {offsets = [0, 0], sizes = [1, 128], strides = [1, 1]} : vector<3x128xf32> to vector<1x128xf32>
    %8 = vector.shape_cast %7 : vector<1x128xf32> to vector<1x128xf32>
    %9 = vector.broadcast %8 : vector<1x128xf32> to vector<128x128xf32>
    %10 = vector.extract_strided_slice %6 {offsets = [1, 0], sizes = [1, 128], strides = [1, 1]} : vector<3x128xf32> to vector<1x128xf32>
    %11 = vector.shape_cast %10 : vector<1x128xf32> to vector<1x128xf32>
    %12 = vector.broadcast %11 : vector<1x128xf32> to vector<128x128xf32>
    %13 = vector.extract_strided_slice %6 {offsets = [2, 0], sizes = [1, 128], strides = [1, 1]} : vector<3x128xf32> to vector<1x128xf32>
    %14 = vector.shape_cast %13 : vector<1x128xf32> to vector<1x128xf32>
    %15 = vector.broadcast %14 : vector<1x128xf32> to vector<128x128xf32>
    %c0_8 = arith.constant 0 : index
    %c0_9 = arith.constant 0 : index
    %16 = vector.load %arg1[%c0_8, %c0_9] : memref<128x128xf32, #tpu.memory_space<vmem>>, vector<128x128xf32>
    %cst = arith.constant dense<0.000000e+00> : vector<128x128xf32>
    %17 = tpu.matmul %16, %1, %cst {dimension_numbers = #tpu.dot_dimension_numbers<[1], [0], [0], [1], [0, 0, 1, 1], [], []>} : vector<128x128xf32>, vector<128x128xf32>, vector<128x128xf32> -> vector<128x128xf32>
    %18 = arith.addf %17, %9 : vector<128x128xf32>
    %19 = arith.addf %18, %16 : vector<128x128xf32>
    %cst_10 = arith.constant 0.000000e+00 : f32
    %20 = vector.broadcast %cst_10 : f32 to vector<128x128xf32>
    %21 = arith.maximumf %19, %20 : vector<128x128xf32>
    %cst_11 = arith.constant dense<0.000000e+00> : vector<128x128xf32>
    %22 = tpu.matmul %21, %3, %cst_11 {dimension_numbers = #tpu.dot_dimension_numbers<[1], [0], [0], [1], [0, 0, 1, 1], [], []>} : vector<128x128xf32>, vector<128x128xf32>, vector<128x128xf32> -> vector<128x128xf32>
    %23 = arith.addf %22, %12 : vector<128x128xf32>
    %24 = arith.addf %23, %21 : vector<128x128xf32>
    %cst_12 = arith.constant 0.000000e+00 : f32
    %25 = vector.broadcast %cst_12 : f32 to vector<128x128xf32>
    %26 = arith.maximumf %24, %25 : vector<128x128xf32>
    %cst_13 = arith.constant dense<0.000000e+00> : vector<128x128xf32>
    %27 = tpu.matmul %26, %5, %cst_13 {dimension_numbers = #tpu.dot_dimension_numbers<[1], [0], [0], [1], [0, 0, 1, 1], [], []>} : vector<128x128xf32>, vector<128x128xf32>, vector<128x128xf32> -> vector<128x128xf32>
    %28 = arith.addf %27, %15 : vector<128x128xf32>
    %c0_14 = arith.constant 0 : index
    %c0_15 = arith.constant 0 : index
    %29 = vector.load %arg4[%c0_14, %c0_15] : memref<128x128xf32, #tpu.memory_space<vmem>>, vector<128x128xf32>
    tpu.vector_store %arg4[%c0_14, %c0_15], %28 {strides = array<i32>} : memref<128x128xf32, #tpu.memory_space<vmem>>, vector<128x128xf32>,
    return
  }
  func.func @transform_0(%arg0: i32) -> (i32, i32) {
    %c0_i32 = arith.constant 0 : i32
    %c0_i32_0 = arith.constant 0 : i32
    return %arg0, %c0_i32 : i32, i32
  }
  func.func @transform_1(%arg0: i32) -> (i32, i32, i32) {
    %c0_i32 = arith.constant 0 : i32
    %c0_i32_0 = arith.constant 0 : i32
    %c0_i32_1 = arith.constant 0 : i32
    %c0_i32_2 = arith.constant 0 : i32
    return %c0_i32, %c0_i32_0, %c0_i32_1 : i32, i32, i32
  }
  func.func @transform_2(%arg0: i32) -> (i32, i32) {
    %c0_i32 = arith.constant 0 : i32
    %c0_i32_0 = arith.constant 0 : i32
    %c0_i32_1 = arith.constant 0 : i32
    return %c0_i32, %c0_i32_0 : i32, i32
  }
  func.func @transform_3(%arg0: i32) -> (i32, i32) {
    %c0_i32 = arith.constant 0 : i32
    %c0_i32_0 = arith.constant 0 : i32
    return %arg0, %c0_i32 : i32, i32
  }
}

</mosaic_0001>

<bundles_post_ra>
// kernel: coder_layer.1
= control target key start
LH: loop header
LB: loop body
LE: loop exit
PB: predicated region body
PF: predicated region fallthrough
CT: control target
= control target key end

     0   :  { %8 = vsyncpa [#allocation3], 0  ;;  %s2038_s0 = inlined_call_operand.hbm [shape: f32[300,128], index: 0, kind: input, shape index: {}]   ;;  %s2039_s1 = inlined_call_operand.hbm [shape: f32[3,128,128], index: 1, kind: input, shape index: {}]   ;;  %s2040_s2 = inlined_call_operand.hbm [shape: f32[3,128], index: 2, kind: input, shape index: {}]   ;;  %s2041_s3 = inlined_call_operand.hbm [shape: f32[300,128], index: 3, kind: output, shape index: {}]  }
   0x1   :  { %10 = vsyncpa [#allocation3 + $0x1], 0 }
   0x2   :  { %11 = vsyncpa [#allocation6], 0 }
   0x3   :  { %12 = vsyncpa [#allocation4], 0 }
   0x4   :  { %14 = vsyncpa [#allocation4 + $0x1], 0  ;;  %s1506_s12 = smov 0   ;;  %s1508_s13 = smov 0  }
   0x5   :  { %s1510_s14 = smov 0   ;;  %s1512_s15 = smov 0  }
   0x6 LB: > { %s1527_s16 = sadd.s32 4294967295, %s1474_s15   ;;  %s938_s17 = sadd.s32 4294967294, %s1474_s15   ;;  %s1474_s15 = sphi %s1512_s15, %s2058_s15   ;;  %s1470_s14 = sphi %s1510_s14, %s2057_s14   ;;  %s1466_s13 = sphi %s1508_s13, %s2056_s13   ;;  %s1462_s12 = sphi %s1506_s12, %s2055_s12  }
   0x7   : > { %s1531_s18 = sadd.s32 1, %s1474_s15   ;;  %s27_s19 = sadd.s32 1, %s1470_s14 }
   0x8   : > { %s24_s20 = ssub.s32 %s1474_s15, %s1531_s18  ;;  %p34_p0 = scmp.ne.s32.totalorder %s1470_s14, %s1466_s13 }
   0x9   : > { %p25_p1 = scmp.eq.s32.totalorder %s24_s20, 0  ;;  %p35_p2 = scmp.eq.s32.totalorder %s1474_s15, 0 }
   0xa   : > { %p40_p3 = scmp.ne.s32.totalorder %s1466_s13, %s1462_s12  ;;  %p2042_p4 = scmp.eq.s32.totalorder %s1527_s16, 0 }
   0xb   : > { %s1543_s21 = scalar_select %p25_p1, %s1470_s14, %s27_s19  }
   0xc   : > { %p1545_p5 = por %p35_p2, %p34_p0  ;;  %p1551_p6 = por %p2042_p4, %p40_p3 }
   0xd   : > { %p106_p7 = scmp.eq.s32.totalorder %s1527_s16, 2  ;;  %p112_p8 = scmp.eq.s32.totalorder %s938_s17, 2 }
   0xe   : > { %s2045_s23 = scalar_select %p1551_p6, 1, 0 }
   0xf   : > { %p939_p9 = scmp.ge.s32.totalorder %s1474_s15, 1  ;;  %p119_p10 = scmp.lt.s32.totalorder %s1474_s15, 4 }
  0x10   : > { %p1558_p11 = por %p106_p7, %p34_p0  ;;  %p1562_p12 = por %p112_p8, %p40_p3 }
  0x11   : > { %p1566_p13 = pnand %p939_p9, %p119_p10  ;;  %s1476_s27 = smov [#allocation5]  }
  0x12   : > { %s2046_s24 = scalar_select %p1558_p11, 1, 0 }
  0x13   : > { %s2047_s25 = scalar_select %p1562_p12, 1, 0 }
  0x14   : > { %p1272_p1 = pneg %p1566_p13  ;;  %s131_s28 = sshll.u32 %s1476_s27, 4  ;;  %s132_s28 = int_to_ptr.vmem [resolvable:$true] %s131_s28 }
  0x15   : > { %s1477_s30 = smov [#allocation7]   ;;  %s1339_s5 = scalar_lea.vmem %s132_s28, 6144 }
  0x16   : > { %p1574_p2 = pnand %p1272_p1, %p2042_p4  ;;  %s145_s4 = sshll.u32 %s1477_s30, 4  ;;  %s146_s4 = int_to_ptr.vmem [resolvable:$true] %s145_s4 }
  0x17   : > { %p1340_p3 = scmp.ne.s32.totalorder %s132_s28, %s1339_s5  ;;  %p1347_p9 = scmp.lt.s32.totalorder %s132_s28, %s132_s28 }
  0x18   : > { %p1330_p0 = pneg %p1574_p2  ;;  %p1348_p10 = scmp.lt.s32.totalorder %s1339_s5, %s1339_s5 }
  0x1a   : > { %p1342_p7 = pnand %p1340_p3, %p1330_p0  ;;  %p1349_p12 = por %p1348_p10, %p1347_p9 }
  0x1c   : > { %p1343_p8 = pneg %p1342_p7 }
  0x1e   : > { %p1350_p1 = pnand %p1349_p12, %p1343_p8 }
  0x20   : > { %1353 = shalt.err (!%p1350_p1)
}
  0x21   : > { %s1478_s6 = smov 128   ;;  %s1479_s7 = smov 8  }
  0x22   : > { %1275 = dma.hbm_to_vmem [thread:$0]  (!%p1574_p2), %s2039_s1, 6144, %s132_s28, [#allocation6], %s1478_s6, %s1478_s6, %s1479_s7  }
  0x23   : > { %s1365_s10 = scalar_lea.vmem %s146_s4, 64  ;;  %p1373_p11 = scmp.lt.s32.totalorder %s146_s4, %s146_s4 }
  0x24   : > { %p1366_p4 = scmp.ne.s32.totalorder %s146_s4, %s1365_s10  ;;  %p1374_p6 = scmp.lt.s32.totalorder %s1365_s10, %s1365_s10 }
  0x26   : > { %p1368_p3 = pnand %p1366_p4, %p1330_p0  ;;  %p1375_p9 = por %p1374_p6, %p1373_p11 }
  0x28   : > { %p1369_p7 = pneg %p1368_p3 }
  0x2a   : > { %p1376_p12 = pnand %p1375_p9, %p1369_p7 }
  0x2c   : > { %1379 = shalt.err (!%p1376_p12)
}
  0x2d   : > { %1278 = dma.hbm_to_vmem [thread:$0]  (!%p1574_p2), %s2040_s2, 64, %s146_s4, [#allocation6]  }
  0x2e   : > { %p942_p8 = scmp.ge.s32.totalorder %s1474_s15, 3 }
  0x30   : > { %152 = sbr.rel (%p942_p8) target bundleno = 85 (0x55), region = 24 }
  0x35   : > { %155 = sbr.rel (!%p1545_p5) target bundleno = 85 (0x55), region = 28  ;;  %s156_s19 = sand.u32 (%p1545_p5), 1, %s1470_s14  }
  0x36   : > { %s944_s20 = sshll.u32 (%p1545_p5), %s1474_s15, 4  ;;  %s943_s27 = sshll.u32 (%p1545_p5), %s156_s19, 7 }
  0x37   : > { %s162_s28 = ssub.s32 (%p1545_p5), 38, %s944_s20  ;;  %s1604_s5 = scalar_lea.sflag (%p1545_p5), [#allocation3], %s156_s19 }
  0x38   : > { %p163_p4 = scmp.lt.s32.totalorder (%p1545_p5), %s162_s28, 16  ;;  %s160_s4 = scalar_lea.vmem (%p1545_p5), [#allocation2], %s943_s27 }
  0x3a   : > { %s2060_s28 = smov (!%p163_p4, %s162_s28), 16 }
  0x3b   : > { %s1601_s30 = sshll.u32 %s2060_s28, 7 }
  0x3c   : > { %s167_s29 = ssub.s32 2048, %s1601_s30 }
  0x3d   : > { %168 = vsyncadd %s1604_s5, %s167_s29  ;;  %p946_p5 = scmp.ne.s32.totalorder %s1601_s30, 0  ;;  %s964_s22 = sshll.u32 %s1474_s15, 11 }
  0x3e   : > { %s1612_s8 = scalar_lea.hbm %s2038_s0, %s964_s22  ;;  %s173_s9 = sshll.u32 %s160_s4, 4  ;;  %s1614_s9 = int_to_ptr.vmem [resolvable:$true] %s173_s9 }
  0x3f   : > { %s1380_s10 = scalar_lea.hbm %s1612_s8, %s1601_s30  ;;  %s1384_s19 = scalar_lea.hbm %s2038_s0, 4864 }
  0x40   : > { %p1381_p6 = scmp.ne.s32.totalorder %s1612_s8, %s1380_s10  ;;  %p1385_p0 = scmp.lt.s32.totalorder %s1612_s8, %s2038_s0 }
  0x41   : > { %p1386_p10 = scmp.lt.s32.totalorder %s1384_s19, %s1380_s10 }
  0x42   : > { %p1382_p11 = pnand %p1381_p6, %p946_p5 }
  0x43   : > { %p1387_p1 = por %p1386_p10, %p1385_p0 }
  0x44   : > { %p1383_p2 = pneg %p1382_p11 }
  0x46   : > { %p1388_p3 = pnand %p1387_p1, %p1383_p2 }
  0x48   : > { %1391 = shalt.err (!%p1388_p3)
}
  0x49   : > { %s1392_s28 = scalar_lea.vmem %s1614_s9, %s1601_s30  ;;  %s1480_s29 = smov [#allocation2]  }
  0x4a   : > { %p1393_p7 = scmp.ne.s32.totalorder %s1614_s9, %s1392_s28  ;;  %s1396_s4 = sshll.u32 %s1480_s29, 4  ;;  %s1397_s4 = int_to_ptr.vmem [resolvable:$false] %s1396_s4 }
  0x4b   : > { %s1398_s22 = scalar_lea.vmem %s1397_s4, 4096  ;;  %p1399_p8 = scmp.lt.s32.totalorder %s1614_s9, %s1397_s4 }
  0x4c   : > { %p1394_p9 = pnand %p1393_p7, %p946_p5  ;;  %p1400_p4 = scmp.lt.s32.totalorder %s1398_s22, %s1392_s28 }
  0x4e   : > { %p1395_p12 = pneg %p1394_p9  ;;  %p1401_p6 = por %p1400_p4, %p1399_p8 }
  0x50   : > { %p1402_p11 = pnand %p1401_p6, %p1395_p12 }
  0x52   : > { %1405 = shalt.err (!%p1402_p11)
}
  0x53   : > { %s1481_s6 = smov 128   ;;  %s1482_s7 = smov 8  }
  0x54   : > { %179 = dma.hbm_to_vmem [thread:$0]  (%p946_p5), %s1612_s8, %s1601_s30, %s1614_s9, %s1604_s5, %s1481_s6, %s1481_s6, %s1482_s7  }
  0x55 PF: > { %185 = sbr.rel (%p1566_p13) target bundleno = 784 (0x310), region = 32  ;;  %s1643_s10 = sand.u32 (!%p1566_p13), 1, %s1466_s13  }
  0x56   : > { %s951_s11 = sshll.u32 (!%p1566_p13), %s1643_s10, 7  ;;  %s188_s17 = scalar_lea.sflag (!%p1566_p13), [#allocation3], %s1643_s10 }
  0x57   : > { %s1649_s19 = scalar_lea.vmem (!%p1566_p13), [#allocation2], %s951_s11  ;;  %p2050_p2 = scmp.ne.s32.totalorder (!%p1566_p13), %s2045_s23, 0 }
  0x5a   : > { %1449 = dma.done.wait (%p2050_p2), %s188_s17, 2048  }
  0x5b   : > { %1451 = vsyncadd (%p2050_p2), %s188_s17, 4294965248  ;;  %p2051_p5 = scmp.eq.s32.totalorder %s1527_s16, 0 }
  0x5d   : > { %1453 = dma.done.wait (%p2051_p5), [#allocation6], 6208   ;;  %p2052_p13 = pmov %p2051_p5 }
  0x5e   : > { %v247_v0 = vld [vmem:[#allocation5 + $0x78] sm:$0xff]  ;;  %v246_v1 = vld [vmem:[#allocation5 + $0x70] sm:$0xff]  ;;  %v245_v2 = vld [vmem:[#allocation5 + $0x68] sm:$0xff]  ;;  %v283_v59 = vlaneseq  ;;  %s1959_s23 = scalar_lea.vmem [#allocation8], %s951_s11  ;;  %s827_s26 = scalar_lea.sflag [#allocation4], %s1643_s10 }
  0x5f   : > { %1455 = vsyncadd (%p2052_p13), [#allocation6], 4294961088  ;;  %1062 = vmatprep.subr.mxu0 %v247_v0  ;;  %v244_v3 = vld [vmem:[#allocation5 + $0x60] sm:$0xff]  ;;  %v243_v5 = vld [vmem:[#allocation5 + $0x58] sm:$0xff]  ;;  %p2053_p0 = scmp.ne.s32.totalorder %s2046_s24, 0 }
  0x60   : > { %1063 = vmatpush3.msra.mxu0 %v247_v0  ;;  %v1660_v4 = vld [vmem:[%s1649_s19] sm:$0xff]  ;;  %v242_v6 = vld [vmem:[#allocation5 + $0x50] sm:$0xff]  ;;  %v241_v7 = vld [vmem:[#allocation5 + $0x48] sm:$0xff]  ;;  %v1763_v60 = vshrl.u32 %v283_v59, 7  ;;  %s956_s30 = sshll.u32 (%p2053_p0), %s1527_s16, 4 }
  0x61   : > { %1064 = vmatprep.subr.mxu0 %v246_v1  ;;  %1094 = vmatprep.mubr.f32.mxu0 %v1660_v4  ;;  %v264_v8 = vld [vmem:[#allocation5 + $0xf8] sm:$0xff]  ;;  %v263_v9 = vld [vmem:[#allocation5 + $0xf0] sm:$0xff]  ;;  %v240_v10 = vld [vmem:[#allocation5 + $0x40] sm:$0xff]  ;;  %s835_s5 = ssub.s32 (%p2053_p0), 38, %s956_s30 }
  0x62   : > { %1065 = vmatpush3.msra.mxu0 %v246_v1  ;;  %1118 = vmatprep.subr.mxu1 %v264_v8  ;;  %v262_v11 = vld [vmem:[#allocation5 + $0xe8] sm:$0xff]  ;;  %v239_v12 = vld [vmem:[#allocation5 + $0x38] sm:$0xff]  ;;  %v261_v13 = vld [vmem:[#allocation5 + $0xe0] sm:$0xff]  ;;  %v285_v61 = vsub.s32 0, %v1763_v60  ;;  %p836_p10 = scmp.lt.s32.totalorder (%p2053_p0), %s835_s5, 16 }
  0x63   : > { %1066 = vmatprep.subr.mxu0 %v245_v2  ;;  %1119 = vmatpush3.msra.mxu1 %v264_v8  ;;  %v238_v14 = vld [vmem:[#allocation5 + $0x30] sm:$0xff]  ;;  %v260_v15 = vld [vmem:[#allocation5 + $0xd8] sm:$0xff]  ;;  %v237_v16 = vld [vmem:[#allocation5 + $0x28] sm:$0xff] }
  0x64   : > { %1067 = vmatpush3.msra.mxu0 %v245_v2  ;;  %1120 = vmatprep.subr.mxu1 %v263_v9  ;;  %v259_v17 = vld [vmem:[#allocation5 + $0xd0] sm:$0xff]  ;;  %v236_v18 = vld [vmem:[#allocation5 + $0x20] sm:$0xff]  ;;  %v258_v19 = vld [vmem:[#allocation5 + $0xc8] sm:$0xff] }
  0x65   : > { %1068 = vmatprep.subr.mxu0 %v244_v3  ;;  %1121 = vmatpush3.msra.mxu1 %v263_v9  ;;  %v235_v20 = vld [vmem:[#allocation5 + $0x18] sm:$0xff]  ;;  %v257_v21 = vld [vmem:[#allocation5 + $0xc0] sm:$0xff]  ;;  %v234_v22 = vld [vmem:[#allocation5 + $0x10] sm:$0xff] }
  0x66   : > { %1069 = vmatpush3.msra.mxu0 %v244_v3  ;;  %1122 = vmatprep.subr.mxu1 %v262_v11  ;;  %v256_v23 = vld [vmem:[#allocation5 + $0xb8] sm:$0xff]  ;;  %v233_v24 = vld [vmem:[#allocation5 + $0x8] sm:$0xff]  ;;  %v255_v25 = vld [vmem:[#allocation5 + $0xb0] sm:$0xff] }
  0x67   : > { %1070 = vmatprep.subr.mxu0 %v243_v5  ;;  %1123 = vmatpush3.msra.mxu1 %v262_v11  ;;  %v232_v26 = vld [vmem:[#allocation5] sm:$0xff]  ;;  %v254_v27 = vld [vmem:[#allocation5 + $0xa8] sm:$0xff]  ;;  %v1667_v29 = vld [vmem:[%s1649_s19 + $0x10] sm:$0xff] }
  0x68   : > { %1071 = vmatpush3.msra.mxu0 %v243_v5  ;;  %1124 = vmatprep.subr.mxu1 %v261_v13  ;;  %v1664_v28 = vld [vmem:[%s1649_s19 + $0x8] sm:$0xff]  ;;  %v1672_v30 = vld [vmem:[%s1649_s19 + $0x18] sm:$0xff]  ;;  %v1675_v31 = vld [vmem:[%s1649_s19 + $0x20] sm:$0xff] }
  0x69   : > { %1072 = vmatprep.subr.mxu0 %v242_v6  ;;  %1125 = vmatpush3.msra.mxu1 %v261_v13  ;;  %v1680_v32 = vld [vmem:[%s1649_s19 + $0x28] sm:$0xff]  ;;  %v1683_v33 = vld [vmem:[%s1649_s19 + $0x30] sm:$0xff]  ;;  %v1688_v34 = vld [vmem:[%s1649_s19 + $0x38] sm:$0xff] }
  0x6a   : > { %1073 = vmatpush3.msra.mxu0 %v242_v6  ;;  %1126 = vmatprep.subr.mxu1 %v260_v15  ;;  %v1691_v35 = vld [vmem:[%s1649_s19 + $0x40] sm:$0xff]  ;;  %v1696_v36 = vld [vmem:[%s1649_s19 + $0x48] sm:$0xff]  ;;  %v1699_v37 = vld [vmem:[%s1649_s19 + $0x50] sm:$0xff] }
  0x6b   : > { %1074 = vmatprep.subr.mxu0 %v241_v7  ;;  %1127 = vmatpush3.msra.mxu1 %v260_v15  ;;  %v1704_v38 = vld [vmem:[%s1649_s19 + $0x58] sm:$0xff]  ;;  %v1707_v39 = vld [vmem:[%s1649_s19 + $0x60] sm:$0xff]  ;;  %v1712_v40 = vld [vmem:[%s1649_s19 + $0x68] sm:$0xff] }
  0x6c   : > { %1075 = vmatpush3.msra.mxu0 %v241_v7  ;;  %1128 = vmatprep.subr.mxu1 %v259_v17  ;;  %v1715_v41 = vld [vmem:[%s1649_s19 + $0x70] sm:$0xff]  ;;  %v1720_v42 = vld [vmem:[%s1649_s19 + $0x78] sm:$0xff]  ;;  %v253_v43 = vld [vmem:[#allocation5 + $0xa0] sm:$0xff] }
  0x6d   : > { %1076 = vmatprep.subr.mxu0 %v240_v10  ;;  %1129 = vmatpush3.msra.mxu1 %v259_v17  ;;  %v252_v44 = vld [vmem:[#allocation5 + $0x98] sm:$0xff]  ;;  %v251_v45 = vld [vmem:[#allocation5 + $0x90] sm:$0xff]  ;;  %v250_v46 = vld [vmem:[#allocation5 + $0x88] sm:$0xff] }
  0x6e   : > { %1077 = vmatpush3.msra.mxu0 %v240_v10  ;;  %1130 = vmatprep.subr.mxu1 %v258_v19  ;;  %v249_v47 = vld [vmem:[#allocation5 + $0x80] sm:$0xff]  ;;  %v281_v48 = vld [vmem:[#allocation5 + $0x178] sm:$0xff]  ;;  %v1723_v49 = vld [vmem:[#allocation5 + $0x170] sm:$0xff] }
  0x6f   : > { %1078 = vmatprep.subr.mxu0 %v239_v12  ;;  %1131 = vmatpush3.msra.mxu1 %v258_v19  ;;  %v1725_v50 = vld [vmem:[#allocation5 + $0x168] sm:$0xff]  ;;  %v1729_v51 = vld [vmem:[#allocation5 + $0x160] sm:$0xff]  ;;  %v1733_v52 = vld [vmem:[#allocation5 + $0x158] sm:$0xff] }
  0x70   : > { %1079 = vmatpush3.msra.mxu0 %v239_v12  ;;  %1132 = vmatprep.subr.mxu1 %v257_v21  ;;  %v1737_v53 = vld [vmem:[#allocation5 + $0x150] sm:$0xff]  ;;  %v1741_v54 = vld [vmem:[#allocation5 + $0x148] sm:$0xff]  ;;  %v1745_v55 = vld [vmem:[#allocation5 + $0x140] sm:$0xff] }
  0x71   : > { %1080 = vmatprep.subr.mxu0 %v238_v14  ;;  %1133 = vmatpush3.msra.mxu1 %v257_v21  ;;  %v1749_v56 = vld [vmem:[#allocation5 + $0x138] sm:$0xff]  ;;  %v1753_v57 = vld [vmem:[#allocation5 + $0x130] sm:$0xff]  ;;  %v1757_v58 = vld [vmem:[#allocation5 + $0x128] sm:$0xff] }
  0x72   : > { %1081 = vmatpush3.msra.mxu0 %v238_v14  ;;  %1134 = vmatprep.subr.mxu1 %v256_v23  ;;  %v1766_v62 = vld [vmem:[#allocation7] sm:$0x7] }
  0x73   : > { %1082 = vmatprep.subr.mxu0 %v237_v16  ;;  %1135 = vmatpush3.msra.mxu1 %v256_v23  ;;  %v1769_v63 = vrot.slane %v1766_v62, %v285_v61 }
  0x74   : > { %1083 = vmatpush3.msra.mxu0 %v237_v16  ;;  %1136 = vmatprep.subr.mxu1 %v255_v25 }
  0x75   : > { %1084 = vmatprep.subr.mxu0 %v236_v18  ;;  %1137 = vmatpush3.msra.mxu1 %v255_v25 }
  0x76   : > { %1085 = vmatpush3.msra.mxu0 %v236_v18  ;;  %1138 = vmatprep.subr.mxu1 %v254_v27 }
  0x77   : > { %1086 = vmatprep.subr.mxu0 %v235_v20  ;;  %1139 = vmatpush3.msra.mxu1 %v254_v27 }
  0x78   : > { %1087 = vmatpush3.msra.mxu0 %v235_v20  ;;  %1140 = vmatprep.subr.mxu1 %v253_v43 }
  0x79   : > { %1088 = vmatprep.subr.mxu0 %v234_v22  ;;  %1141 = vmatpush3.msra.mxu1 %v253_v43 }
  0x7a   : > { %1089 = vmatpush3.msra.mxu0 %v234_v22  ;;  %1142 = vmatprep.subr.mxu1 %v252_v44 }
  0x7b   : > { %1090 = vmatprep.subr.mxu0 %v233_v24  ;;  %1143 = vmatpush3.msra.mxu1 %v252_v44 }
  0x7c   : > { %1091 = vmatpush3.msra.mxu0 %v233_v24  ;;  %1144 = vmatprep.subr.mxu1 %v251_v45 }
  0x7d   : > { %1092 = vmatprep.subr.mxu0 %v232_v26  ;;  %1145 = vmatpush3.msra.mxu1 %v251_v45 }
  0x7e   : > { %1093 = vmatpush3.msra.mxu0 %v232_v26  ;;  %1146 = vmatprep.subr.mxu1 %v250_v46 }
  0x7f   : > { %1095 = vmatmul.mubr.f32.vlgmr.msra.gmra.mxu0 %v1664_v28  ;;  %1147 = vmatpush3.msra.mxu1 %v250_v46 }
  0x80   : > { %1097 = vmatprep.mubr.f32.mxu0 %v1667_v29  ;;  %1148 = vmatprep.subr.mxu1 %v249_v47 }
  0x81   : > { %1149 = vmatpush3.msra.mxu1 %v249_v47  ;;  %1174 = vmatprep.subr.mxu0 %v281_v48 }
  0x82   : > { %1230 = vmatprep.subr.mxu1 %v281_v48  ;;  %1175 = vmatpush3.msra.mxu0 %v281_v48 }
  0x83   : > { %1098 = vmatmul.mubr.f32.gmra.mxu0 %v1672_v30  ;;  %1176 = vmatprep.subr.mxu0 %v1723_v49 }
  0x84   : > { %1100 = vmatprep.mubr.f32.mxu0 %v1675_v31  ;;  %1177 = vmatpush3.msra.mxu0 %v1723_v49 }
  0x85   : > { %1178 = vmatprep.subr.mxu0 %v1725_v50 }
  0x86   : > { %1179 = vmatpush3.msra.mxu0 %v1725_v50 }
  0x87   : > { %1101 = vmatmul.mubr.f32.gmra.mxu0 %v1680_v32  ;;  %1180 = vmatprep.subr.mxu0 %v1729_v51 }
  0x88   : > { %1103 = vmatprep.mubr.f32.mxu0 %v1683_v33  ;;  %1181 = vmatpush3.msra.mxu0 %v1729_v51 }
  0x89   : > { %1182 = vmatprep.subr.mxu0 %v1733_v52 }
  0x8a   : > { %1183 = vmatpush3.msra.mxu0 %v1733_v52 }
  0x8b   : > { %1104 = vmatmul.mubr.f32.gmra.mxu0 %v1688_v34  ;;  %1184 = vmatprep.subr.mxu0 %v1737_v53 }
  0x8c   : > { %1106 = vmatprep.mubr.f32.mxu0 %v1691_v35  ;;  %1185 = vmatpush3.msra.mxu0 %v1737_v53 }
  0x8d   : > { %1186 = vmatprep.subr.mxu0 %v1741_v54 }
  0x8e   : > { %1187 = vmatpush3.msra.mxu0 %v1741_v54 }
  0x8f   : > { %1107 = vmatmul.mubr.f32.gmra.mxu0 %v1696_v36  ;;  %1188 = vmatprep.subr.mxu0 %v1745_v55 }
  0x90   : > { %1109 = vmatprep.mubr.f32.mxu0 %v1699_v37  ;;  %1189 = vmatpush3.msra.mxu0 %v1745_v55 }
  0x91   : > { %1190 = vmatprep.subr.mxu0 %v1749_v56 }
  0x92   : > { %1191 = vmatpush3.msra.mxu0 %v1749_v56 }
  0x93   : > { %1110 = vmatmul.mubr.f32.gmra.mxu0 %v1704_v38  ;;  %1192 = vmatprep.subr.mxu0 %v1753_v57 }
  0x94   : > { %1112 = vmatprep.mubr.f32.mxu0 %v1707_v39  ;;  %1193 = vmatpush3.msra.mxu0 %v1753_v57 }
  0x95   : > { %1194 = vmatprep.subr.mxu0 %v1757_v58 }
  0x96   : > { %1195 = vmatpush3.msra.mxu0 %v1757_v58 }
  0x97   : > { %1113 = vmatmul.mubr.f32.gmra.mxu0 %v1712_v40 }
  0x98   : > { %1115 = vmatprep.mubr.f32.mxu0 %v1715_v41 }
  0x9b   : > { %1116 = vmatmul.mubr.f32.gmra.mxu0 %v1720_v42 }
 0x13f   : > { %v1096_v0 = vpop.f32.mrf.mxu0 }
 0x140   : > { %v383_v1 = vadd.f32 %v1096_v0, %v1769_v63 }
 0x141   : > { %v377_v2 = vpop.f32.mrf.mxu0 }
 0x142   : > { %v378_v3 = vadd.f32 %v377_v2, %v1769_v63  ;;  %v1774_v5 = vadd.f32 %v383_v1, %v1664_v28 }
 0x143   : > { %v1099_v6 = vpop.f32.mrf.mxu0 }
 0x144   : > { %v393_v7 = vadd.f32 %v1099_v6, %v1769_v63  ;;  %v1778_v8 = vadd.f32 %v378_v3, %v1660_v4  ;;  %v473_v12 = vmax.f32 %v1774_v5, 0.0 }
 0x145   : > { %v387_v9 = vpop.f32.mrf.mxu0 }
 0x146   : > { %v388_v10 = vadd.f32 %v387_v9, %v1769_v63  ;;  %v472_v11 = vmax.f32 %v1778_v8, 0.0  ;;  %v1784_v13 = vadd.f32 %v393_v7, %v1672_v30  ;;  %v267_v7 = vld [vmem:[#allocation5 + $0x108] sm:$0xff]  ;;  %v266_v9 = vld [vmem:[#allocation5 + $0x100] sm:$0xff] }
 0x147   : > { %v1102_v14 = vpop.f32.mrf.mxu0 }
 0x148   : > { %v1787_v15 = vadd.f32 %v388_v10, %v1667_v29  ;;  %v403_v16 = vadd.f32 %v1102_v14, %v1769_v63  ;;  %1150 = vmatprep.mubr.f32.mxu1 %v472_v11  ;;  %v475_v19 = vmax.f32 %v1784_v13, 0.0  ;;  %v289_v10 = vsub.s32 1, %v1763_v60 }
 0x149   : > { %v397_v4 = vpop.f32.mrf.mxu0  ;;  %1151 = vmatmul.mubr.f32.vlgmr.msra.gmra.mxu1 %v473_v12 }
 0x14a   : > { %v474_v17 = vmax.f32 %v1787_v15, 0.0  ;;  %v398_v18 = vadd.f32 %v397_v4, %v1769_v63  ;;  %1246 = vmatpush3.msra.mxu1 %v281_v48  ;;  %v1798_v20 = vadd.f32 %v403_v16, %v1680_v32  ;;  %v1905_v14 = vrot.slane %v1766_v62, %v289_v10 }
 0x14b   : > { %v1105_v21 = vpop.f32.mrf.mxu0  ;;  %1231 = vmatprep.subr.mxu1 %v1723_v49 }
 0x14c   : > { %v1802_v22 = vadd.f32 %v398_v18, %v1675_v31  ;;  %v413_v23 = vadd.f32 %v1105_v21, %v1769_v63  ;;  %1153 = vmatprep.mubr.f32.mxu1 %v474_v17  ;;  %1247 = vmatpush3.msra.mxu1 %v1723_v49  ;;  %v477_v27 = vmax.f32 %v1798_v20, 0.0 }
 0x14d   : > { %v407_v24 = vpop.f32.mrf.mxu0  ;;  %1154 = vmatmul.mubr.f32.gmra.mxu1 %v475_v19  ;;  %1232 = vmatprep.subr.mxu1 %v1725_v50 }
 0x14e   : > { %v476_v25 = vmax.f32 %v1802_v22, 0.0  ;;  %v408_v26 = vadd.f32 %v407_v24, %v1769_v63  ;;  %1248 = vmatpush3.msra.mxu1 %v1725_v50  ;;  %v1816_v28 = vadd.f32 %v413_v23, %v1688_v34 }
 0x14f   : > { %v1108_v29 = vpop.f32.mrf.mxu0  ;;  %1233 = vmatprep.subr.mxu1 %v1729_v51 }
 0x150   : > { %v1820_v30 = vadd.f32 %v408_v26, %v1683_v33  ;;  %v423_v31 = vadd.f32 %v1108_v29, %v1769_v63  ;;  %1156 = vmatprep.mubr.f32.mxu1 %v476_v25  ;;  %1249 = vmatpush3.msra.mxu1 %v1729_v51  ;;  %v479_v33 = vmax.f32 %v1816_v28, 0.0 }
 0x151   : > { %v417_v32 = vpop.f32.mrf.mxu0  ;;  %1157 = vmatmul.mubr.f32.gmra.mxu1 %v477_v27  ;;  %1234 = vmatprep.subr.mxu1 %v1733_v52 }
 0x152   : > { %v478_v34 = vmax.f32 %v1820_v30, 0.0  ;;  %v418_v43 = vadd.f32 %v417_v32, %v1769_v63  ;;  %1250 = vmatpush3.msra.mxu1 %v1733_v52  ;;  %v1834_v44 = vadd.f32 %v423_v31, %v1696_v36 }
 0x153   : > { %v1111_v45 = vpop.f32.mrf.mxu0  ;;  %1235 = vmatprep.subr.mxu1 %v1737_v53 }
 0x154   : > { %v1838_v46 = vadd.f32 %v418_v43, %v1691_v35  ;;  %v433_v47 = vadd.f32 %v1111_v45, %v1769_v63  ;;  %1159 = vmatprep.mubr.f32.mxu1 %v478_v34  ;;  %1251 = vmatpush3.msra.mxu1 %v1737_v53  ;;  %v481_v35 = vmax.f32 %v1834_v44, 0.0 }
 0x155   : > { %v427_v48 = vpop.f32.mrf.mxu0  ;;  %1160 = vmatmul.mubr.f32.gmra.mxu1 %v479_v33  ;;  %1236 = vmatprep.subr.mxu1 %v1741_v54 }
 0x156   : > { %v480_v36 = vmax.f32 %v1838_v46, 0.0  ;;  %v428_v49 = vadd.f32 %v427_v48, %v1769_v63  ;;  %1252 = vmatpush3.msra.mxu1 %v1741_v54  ;;  %v1852_v50 = vadd.f32 %v433_v47, %v1704_v38 }
 0x157   : > { %v1114_v51 = vpop.f32.mrf.mxu0  ;;  %1237 = vmatprep.subr.mxu1 %v1745_v55 }
 0x158   : > { %v1856_v52 = vadd.f32 %v428_v49, %v1699_v37  ;;  %v443_v53 = vadd.f32 %v1114_v51, %v1769_v63  ;;  %1162 = vmatprep.mubr.f32.mxu1 %v480_v36  ;;  %1253 = vmatpush3.msra.mxu1 %v1745_v55  ;;  %v483_v37 = vmax.f32 %v1852_v50, 0.0 }
 0x159   : > { %v437_v59 = vpop.f32.mrf.mxu0  ;;  %1163 = vmatmul.mubr.f32.gmra.mxu1 %v481_v35  ;;  %1238 = vmatprep.subr.mxu1 %v1749_v56 }
 0x15a   : > { %v482_v38 = vmax.f32 %v1856_v52, 0.0  ;;  %v438_v54 = vadd.f32 %v437_v59, %v1769_v63  ;;  %1254 = vmatpush3.msra.mxu1 %v1749_v56  ;;  %v1870_v61 = vadd.f32 %v443_v53, %v1712_v40 }
 0x15b   : > { %v1117_v0 = vpop.f32.mrf.mxu0  ;;  %1239 = vmatprep.subr.mxu1 %v1753_v57 }
 0x15c   : > { %v1874_v55 = vadd.f32 %v438_v54, %v1707_v39  ;;  %v453_v1 = vadd.f32 %v1117_v0, %v1769_v63  ;;  %1165 = vmatprep.mubr.f32.mxu1 %v482_v38  ;;  %1255 = vmatpush3.msra.mxu1 %v1753_v57  ;;  %v485_v39 = vmax.f32 %v1870_v61, 0.0 }
 0x15d   : > { %v447_v2 = vpop.f32.mrf.mxu0  ;;  %1166 = vmatmul.mubr.f32.gmra.mxu1 %v483_v37  ;;  %1240 = vmatprep.subr.mxu1 %v1757_v58 }
 0x15e   : > { %v484_v40 = vmax.f32 %v1874_v55, 0.0  ;;  %v448_v56 = vadd.f32 %v447_v2, %v1769_v63  ;;  %1256 = vmatpush3.msra.mxu1 %v1757_v58  ;;  %v1888_v3 = vadd.f32 %v453_v1, %v1720_v42  ;;  %v270_v42 = vld [vmem:[#allocation5 + $0x120] sm:$0xff]  ;;  %v268_v58 = vld [vmem:[#allocation5 + $0x110] sm:$0xff] }
 0x15f   : > { %1196 = vmatprep.subr.mxu0 %v270_v42  ;;  %1241 = vmatprep.subr.mxu1 %v270_v42 }
 0x160   : > { %v1891_v6 = vadd.f32 %v448_v56, %v1715_v41  ;;  %1168 = vmatprep.mubr.f32.mxu1 %v484_v40  ;;  %v487_v63 = vmax.f32 %v1888_v3, 0.0  ;;  %1197 = vmatpush3.msra.mxu0 %v270_v42  ;;  %v269_v41 = vld [vmem:[#allocation5 + $0x118] sm:$0xff] }
 0x161   : > { %1169 = vmatmul.mubr.f32.gmra.mxu1 %v485_v39  ;;  %1198 = vmatprep.subr.mxu0 %v269_v41 }
 0x162   : > { %v486_v57 = vmax.f32 %v1891_v6, 0.0  ;;  %1257 = vmatpush3.msra.mxu1 %v270_v42  ;;  %1199 = vmatpush3.msra.mxu0 %v269_v41 }
 0x163   : > { %1242 = vmatprep.subr.mxu1 %v269_v41  ;;  %1200 = vmatprep.subr.mxu0 %v268_v58 }
 0x164   : > { %1171 = vmatprep.mubr.f32.mxu1 %v486_v57  ;;  %1258 = vmatpush3.msra.mxu1 %v269_v41 }
 0x165   : > { %1172 = vmatmul.mubr.f32.gmra.mxu1 %v487_v63  ;;  %1243 = vmatprep.subr.mxu1 %v268_v58 }
 0x166   : > { %1201 = vmatpush3.msra.mxu0 %v268_v58  ;;  %1259 = vmatpush3.msra.mxu1 %v268_v58 }
 0x167   : > { %1202 = vmatprep.subr.mxu0 %v267_v7  ;;  %1244 = vmatprep.subr.mxu1 %v267_v7 }
 0x168   : > { %1203 = vmatpush3.msra.mxu0 %v267_v7  ;;  %1260 = vmatpush3.msra.mxu1 %v267_v7 }
 0x169   : > { %1204 = vmatprep.subr.mxu0 %v266_v9  ;;  %1245 = vmatprep.subr.mxu1 %v266_v9 }
 0x16a   : > { %1205 = vmatpush3.msra.mxu0 %v266_v9  ;;  %1261 = vmatpush3.msra.mxu1 %v266_v9 }
 0x209   : > { %v1152_v16 = vpop.f32.mrf.mxu1 }
 0x20a   : > { %v560_v4 = vadd.f32 %v1152_v16, %v1905_v14 }
 0x20b   : > { %v554_v18 = vpop.f32.mrf.mxu1 }
 0x20c   : > { %v555_v21 = vadd.f32 %v554_v18, %v1905_v14  ;;  %v634_v23 = vadd.f32 %v560_v4, %v473_v12 }
 0x20d   : > { %v1155_v24 = vpop.f32.mrf.mxu1 }
 0x20e   : > { %v633_v26 = vadd.f32 %v555_v21, %v472_v11  ;;  %v570_v29 = vadd.f32 %v1155_v24, %v1905_v14  ;;  %v650_v45 = vmax.f32 %v634_v23, 0.0 }
 0x20f   : > { %v564_v31 = vpop.f32.mrf.mxu1 }
 0x210   : > { %v649_v32 = vmax.f32 %v633_v26, 0.0  ;;  %v565_v43 = vadd.f32 %v564_v31, %v1905_v14  ;;  %v636_v47 = vadd.f32 %v570_v29, %v475_v19 }
 0x211   : > { %v1158_v48 = vpop.f32.mrf.mxu1 }
 0x212   : > { %v635_v49 = vadd.f32 %v565_v43, %v474_v17  ;;  %v580_v5 = vadd.f32 %v1158_v48, %v1905_v14  ;;  %1206 = vmatprep.mubr.f32.mxu0 %v649_v32  ;;  %v652_v51 = vmax.f32 %v636_v47, 0.0 }
 0x213   : > { %v574_v12 = vpop.f32.mrf.mxu1  ;;  %1207 = vmatmul.mubr.f32.vlgmr.msra.gmra.mxu0 %v650_v45 }
 0x214   : > { %v651_v8 = vmax.f32 %v635_v49, 0.0  ;;  %v575_v11 = vadd.f32 %v574_v12, %v1905_v14  ;;  %v638_v53 = vadd.f32 %v580_v5, %v477_v27 }
 0x215   : > { %v1161_v59 = vpop.f32.mrf.mxu1 }
 0x216   : > { %v637_v13 = vadd.f32 %v575_v11, %v476_v25  ;;  %v590_v19 = vadd.f32 %v1161_v59, %v1905_v14  ;;  %1209 = vmatprep.mubr.f32.mxu0 %v651_v8  ;;  %v654_v0 = vmax.f32 %v638_v53, 0.0 }
 0x217   : > { %v584_v15 = vpop.f32.mrf.mxu1  ;;  %1210 = vmatmul.mubr.f32.gmra.mxu0 %v652_v51 }
 0x218   : > { %v653_v17 = vmax.f32 %v637_v13, 0.0  ;;  %v585_v54 = vadd.f32 %v584_v15, %v1905_v14  ;;  %v640_v1 = vadd.f32 %v590_v19, %v479_v33 }
 0x219   : > { %v1164_v2 = vpop.f32.mrf.mxu1 }
 0x21a   : > { %v639_v20 = vadd.f32 %v585_v54, %v478_v34  ;;  %v600_v27 = vadd.f32 %v1164_v2, %v1905_v14  ;;  %1212 = vmatprep.mubr.f32.mxu0 %v653_v17  ;;  %v656_v42 = vmax.f32 %v640_v1, 0.0 }
 0x21b   : > { %v594_v22 = vpop.f32.mrf.mxu1  ;;  %1213 = vmatmul.mubr.f32.gmra.mxu0 %v654_v0 }
 0x21c   : > { %v655_v25 = vmax.f32 %v639_v20, 0.0  ;;  %v595_v56 = vadd.f32 %v594_v22, %v1905_v14  ;;  %v642_v41 = vadd.f32 %v600_v27, %v481_v35 }
 0x21d   : > { %v1167_v58 = vpop.f32.mrf.mxu1 }
 0x21e   : > { %v641_v28 = vadd.f32 %v595_v56, %v480_v36  ;;  %v610_v33 = vadd.f32 %v1167_v58, %v1905_v14  ;;  %1215 = vmatprep.mubr.f32.mxu0 %v655_v25  ;;  %v658_v9 = vmax.f32 %v642_v41, 0.0 }
 0x21f   : > { %v604_v30 = vpop.f32.mrf.mxu1  ;;  %1216 = vmatmul.mubr.f32.gmra.mxu0 %v656_v42 }
 0x220   : > { %v657_v34 = vmax.f32 %v641_v28, 0.0  ;;  %v605_v7 = vadd.f32 %v604_v30, %v1905_v14  ;;  %v644_v10 = vadd.f32 %v610_v33, %v483_v37 }
 0x221   : > { %v1170_v16 = vpop.f32.mrf.mxu1 }
 0x222   : > { %v643_v44 = vadd.f32 %v605_v7, %v482_v38  ;;  %v620_v35 = vadd.f32 %v1170_v16, %v1905_v14  ;;  %1218 = vmatprep.mubr.f32.mxu1 %v657_v34  ;;  %v660_v18 = vmax.f32 %v644_v10, 0.0 }
 0x223   : > { %v614_v46 = vpop.f32.mrf.mxu1  ;;  %1219 = vmatmul.mubr.f32.vlgmr.msra.gmra.mxu1 %v658_v9 }
 0x224   : > { %v659_v36 = vmax.f32 %v643_v44, 0.0  ;;  %v615_v4 = vadd.f32 %v614_v46, %v1905_v14  ;;  %v646_v21 = vadd.f32 %v620_v35, %v485_v39  ;;  %v293_v39 = vsub.s32 2, %v1763_v60 }
 0x225   : > { %v1173_v23 = vpop.f32.mrf.mxu1 }
 0x226   : > { %v645_v50 = vadd.f32 %v615_v4, %v484_v40  ;;  %v630_v37 = vadd.f32 %v1173_v23, %v1905_v14  ;;  %1221 = vmatprep.mubr.f32.mxu1 %v659_v36  ;;  %v662_v26 = vmax.f32 %v646_v21, 0.0  ;;  %v294_v31 = vrot.slane %v1766_v62, %v293_v39 }
 0x227   : > { %v624_v52 = vpop.f32.mrf.mxu1  ;;  %1222 = vmatmul.mubr.f32.gmra.mxu1 %v660_v18 }
 0x228   : > { %v661_v38 = vmax.f32 %v645_v50, 0.0  ;;  %v625_v24 = vadd.f32 %v624_v52, %v1905_v14  ;;  %v648_v29 = vadd.f32 %v630_v37, %v487_v63 }
 0x22a   : > { %v647_v61 = vadd.f32 %v625_v24, %v486_v57  ;;  %1224 = vmatprep.mubr.f32.mxu1 %v661_v38  ;;  %v664_v40 = vmax.f32 %v648_v29, 0.0 }
 0x22b   : > { %1225 = vmatmul.mubr.f32.gmra.mxu1 %v662_v26 }
 0x22c   : > { %v663_v55 = vmax.f32 %v647_v61, 0.0 }
 0x22e   : > { %1227 = vmatprep.mubr.f32.mxu1 %v663_v55 }
 0x22f   : > { %1228 = vmatmul.mubr.f32.gmra.mxu1 %v664_v40 }
 0x2d3   : > { %v1208_v32 = vpop.f32.mrf.mxu0 }
 0x2d4   : > { %v737_v43 = vadd.f32 %v1208_v32, %v294_v31 }
 0x2d5   : > { %v731_v14 = vpop.f32.mrf.mxu0 }
 0x2d6   : > { %811 = vst [vmem:[%s1959_s23 + $0x8] sm:$0xff] %v737_v43  ;;  %v732_v3 = vadd.f32 %v731_v14, %v294_v31 }
 0x2d7   : > { %v1211_v6 = vpop.f32.mrf.mxu0 }
 0x2d8   : > { %810 = vst [vmem:[%s1959_s23] sm:$0xff] %v732_v3  ;;  %v747_v60 = vadd.f32 %v1211_v6, %v294_v31 }
 0x2d9   : > { %v741_v57 = vpop.f32.mrf.mxu0 }
 0x2da   : > { %813 = vst [vmem:[%s1959_s23 + $0x18] sm:$0xff] %v747_v60  ;;  %v742_v62 = vadd.f32 %v741_v57, %v294_v31 }
 0x2db   : > { %v1214_v63 = vpop.f32.mrf.mxu0 }
 0x2dc   : > { %812 = vst [vmem:[%s1959_s23 + $0x10] sm:$0xff] %v742_v62  ;;  %v757_v45 = vadd.f32 %v1214_v63, %v294_v31 }
 0x2dd   : > { %v751_v47 = vpop.f32.mrf.mxu0 }
 0x2de   : > { %815 = vst [vmem:[%s1959_s23 + $0x28] sm:$0xff] %v757_v45  ;;  %v752_v48 = vadd.f32 %v751_v47, %v294_v31 }
 0x2df   : > { %v1217_v49 = vpop.f32.mrf.mxu0 }
 0x2e0   : > { %814 = vst [vmem:[%s1959_s23 + $0x20] sm:$0xff] %v752_v48  ;;  %v767_v5 = vadd.f32 %v1217_v49, %v294_v31 }
 0x2e1   : > { %v761_v12 = vpop.f32.mrf.mxu0 }
 0x2e2   : > { %817 = vst [vmem:[%s1959_s23 + $0x38] sm:$0xff] %v767_v5  ;;  %v762_v8 = vadd.f32 %v761_v12, %v294_v31 }
 0x2e3   : > { %v1220_v11 = vpop.f32.mrf.mxu1 }
 0x2e4   : > { %816 = vst [vmem:[%s1959_s23 + $0x30] sm:$0xff] %v762_v8  ;;  %v777_v51 = vadd.f32 %v1220_v11, %v294_v31 }
 0x2e5   : > { %v771_v53 = vpop.f32.mrf.mxu1 }
 0x2e6   : > { %819 = vst [vmem:[%s1959_s23 + $0x48] sm:$0xff] %v777_v51  ;;  %v772_v59 = vadd.f32 %v771_v53, %v294_v31 }
 0x2e7   : > { %v1223_v13 = vpop.f32.mrf.mxu1 }
 0x2e8   : > { %818 = vst [vmem:[%s1959_s23 + $0x40] sm:$0xff] %v772_v59  ;;  %v787_v19 = vadd.f32 %v1223_v13, %v294_v31 }
 0x2e9   : > { %v781_v15 = vpop.f32.mrf.mxu1 }
 0x2ea   : > { %821 = vst [vmem:[%s1959_s23 + $0x58] sm:$0xff] %v787_v19  ;;  %v782_v17 = vadd.f32 %v781_v15, %v294_v31 }
 0x2eb   : > { %v1226_v54 = vpop.f32.mrf.mxu1 }
 0x2ec   : > { %820 = vst [vmem:[%s1959_s23 + $0x50] sm:$0xff] %v782_v17  ;;  %v797_v0 = vadd.f32 %v1226_v54, %v294_v31 }
 0x2ed   : > { %v791_v1 = vpop.f32.mrf.mxu1 }
 0x2ee   : > { %823 = vst [vmem:[%s1959_s23 + $0x68] sm:$0xff] %v797_v0  ;;  %v792_v2 = vadd.f32 %v791_v1, %v294_v31 }
 0x2ef   : > { %v1229_v20 = vpop.f32.mrf.mxu1 }
 0x2f0   : > { %822 = vst [vmem:[%s1959_s23 + $0x60] sm:$0xff] %v792_v2  ;;  %v807_v27 = vadd.f32 %v1229_v20, %v294_v31  ;;  %833 = sbr.rel (!%p2053_p0) target bundleno = 784 (0x310), region = 48 }
 0x2f1   : > { %v801_v22 = vpop.f32.mrf.mxu1 }
 0x2f2   : > { %825 = vst [vmem:[%s1959_s23 + $0x78] sm:$0xff] %v807_v27  ;;  %v802_v25 = vadd.f32 %v801_v22, %v294_v31 }
 0x2f4   : > { %824 = vst [vmem:[%s1959_s23 + $0x70] sm:$0xff] %v802_v25 }
 0x2f5   : > { %s2062_s5 = smov (!%p836_p10, %s835_s5), 16 }
 0x2f6   : > { %s1981_s8 = sshll.u32 %s2062_s5, 7 }
 0x2f7   : > { %s840_s9 = ssub.s32 2048, %s1981_s8 }
 0x2f8   : > { %841 = vsyncadd %s827_s26, %s840_s9  ;;  %p958_p1 = scmp.ne.s32.totalorder %s1981_s8, 0  ;;  %s965_s24 = sshll.u32 %s1527_s16, 11 }
 0x2f9   : > { %s1991_s28 = scalar_lea.hbm %s2041_s3, %s965_s24  ;;  %s846_s29 = sshll.u32 %s1959_s23, 4  ;;  %s1994_s29 = int_to_ptr.vmem [resolvable:$true] %s846_s29 }
 0x2fa   : > { %s1406_s4 = scalar_lea.vmem %s1994_s29, %s1981_s8  ;;  %s1483_s22 = smov [#allocation8]  }
 0x2fb   : > { %p1407_p3 = scmp.ne.s32.totalorder %s1994_s29, %s1406_s4  ;;  %s1410_s6 = sshll.u32 %s1483_s22, 4  ;;  %s1411_s6 = int_to_ptr.vmem [resolvable:$false] %s1410_s6 }
 0x2fc   : > { %s1412_s16 = scalar_lea.vmem %s1411_s6, 4096  ;;  %p1413_p12 = scmp.lt.s32.totalorder %s1994_s29, %s1411_s6 }
 0x2fd   : > { %p1408_p7 = pnand %p1407_p3, %p958_p1  ;;  %p1414_p8 = scmp.lt.s32.totalorder %s1412_s16, %s1406_s4 }
 0x2ff   : > { %p1409_p9 = pneg %p1408_p7  ;;  %p1415_p4 = por %p1414_p8, %p1413_p12 }
 0x301   : > { %p1416_p6 = pnand %p1415_p4, %p1409_p9 }
 0x303   : > { %1419 = shalt.err (!%p1416_p6)
}
 0x304   : > { %s1420_s7 = scalar_lea.hbm %s1991_s28, %s1981_s8  ;;  %s1424_s19 = scalar_lea.hbm %s2041_s3, 4864 }
 0x305   : > { %p1421_p11 = scmp.ne.s32.totalorder %s1991_s28, %s1420_s7  ;;  %p1425_p13 = scmp.lt.s32.totalorder %s1991_s28, %s2041_s3 }
 0x306   : > { %p1426_p0 = scmp.lt.s32.totalorder %s1424_s19, %s1420_s7 }
 0x307   : > { %p1422_p2 = pnand %p1421_p11, %p958_p1 }
 0x308   : > { %p1427_p10 = por %p1426_p0, %p1425_p13 }
 0x309   : > { %p1423_p5 = pneg %p1422_p2 }
 0x30b   : > { %p1428_p3 = pnand %p1427_p10, %p1423_p5 }
 0x30d   : > { %1431 = shalt.err (!%p1428_p3)
}
 0x30e   : > { %s1484_s5 = smov 128   ;;  %s1485_s9 = smov 8  }
 0x30f   : > { %852 = dma.vmem_to_hbm [thread:$0]  (%p958_p1), %s1994_s29, %s1981_s8, %s1991_s28, %s827_s26, %s1484_s5, %s1484_s5, %s1485_s9  }
 0x310 PF: > { %p1287_p7 = scmp.ge.s32.totalorder %s1474_s15, 2  ;;  %s861_s24 = sand.u32 1, %s1462_s12  }
 0x311   : > { %p2054_p9 = scmp.ne.s32.totalorder %s2047_s25, 0  ;;  %s862_s20 = scalar_lea.sflag [#allocation4], %s861_s24 }
 0x313   : > { %p1280_p12 = pnand %p1287_p7, %p2054_p9 }
 0x315   : > { %p1281_p8 = pneg %p1280_p12 }
 0x317   : > { %1457 = dma.done.wait (%p1281_p8), %s862_s20, 2048  }
 0x318   : > { %1459 = vsyncadd (%p1281_p8), %s862_s20, 4294965248  ;;  %p17_p4 = scmp.ge.s32.totalorder %s1531_s18, 5   ;;  %s2055_s12 = smov %s1466_s13 }
 0x319   : > { %s2056_s13 = smov %s1470_s14  ;;  %s2057_s14 = smov %s1543_s21 }
 0x31a   : > { %s2058_s15 = smov %s1531_s18  ;;  %19 = sbr.rel (!%p17_p4) target bundleno = 6 (0x6), region = 87 }
 0x31f   :  { %867 = vsyncpa [#allocation3], 1 }
 0x320   :  { %869 = vsyncpa [#allocation3 + $0x1], 1 }
 0x321   :  { %870 = vsyncpa [#allocation6], 1 }
 0x322   :  { %871 = vsyncpa [#allocation4], 1 }
 0x323   :  { %873 = vsyncpa [#allocation4 + $0x1], 1 }

</bundles_post_ra>
